<compile_context>
chip_gen: v5e
topology: v5e:2x2
jax: 0.10.0
libtpu: 0.0.40
codegen_flags: <defaults>
</compile_context>

<pallas_src>
import functools

import jax
import jax.numpy as jnp
from jax import lax
from jax.experimental import pallas as pl
from jax.experimental.pallas import tpu as pltpu


def _round_up(x, m):
    return (x + m - 1) // m * m


# ----------------------------------------------------------------------------
# Fused selector + temporal-scoring kernel (one tile of TN snippets per step)
# ----------------------------------------------------------------------------
def _fused_kernel(x_ref, nc_ref, wcat_ref, w1l_ref, b1_ref, w2_ref, b2_ref,
                  out_ref, *, cpad, score_col, concat_features):
    # Elementwise math in f32 (v5e has no bf16 VPU/EUP path); MXU operands bf16.
    x = x_ref[...].astype(jnp.float32)                        # (TN, D) f32 from HBM
    nc = nc_ref[...].astype(jnp.float32)                      # (1, D)
    xc = x - nc                                               # centered features

    # L2-normalization commuted past the matmul: xn @ T == inv_norm * (xc @ T).
    inv_norm = lax.rsqrt(jnp.sum(xc * xc, axis=-1, keepdims=True) + 1e-12)

    # Single MXU pass over [T_learned | T_desc | W1_x]; every slab 128-lane
    # aligned so the slices below are free.
    raw = jnp.dot(xc.astype(wcat_ref.dtype), wcat_ref[...],
                  preferred_element_type=jnp.float32)         # (TN, 2*cpad+epad)

    # ---- selector ----------------------------------------------------------
    l_all = raw[:, :2 * cpad] * inv_norm                      # scale only text cols
    # torch.where(logits > logits_desc, logits, logits_desc)
    logits = jnp.maximum(l_all[:, :cpad], l_all[:, cpad:])    # (TN, cpad)

    # ---- temporal scoring head ---------------------------------------------
    # concat(logits, xc) @ [W1_l; W1_x] == logits @ W1_l + xc @ W1_x
    h = raw[:, 2 * cpad:]                                     # xc @ W1_x (unnormalized)
    if concat_features:  # trace-time branch: no dead matmul when disabled
        h = h + jnp.dot(logits.astype(w1l_ref.dtype), w1l_ref[...],
                        preferred_element_type=jnp.float32)
    h = jnp.maximum(h + b1_ref[...].astype(jnp.float32), 0.0)

    # score = sigmoid(h @ w2 + b2) as VPU multiply + XLU row-reduce.
    s = jnp.sum(h * w2_ref[...].astype(jnp.float32), axis=-1, keepdims=True)
    s = jax.nn.sigmoid(s + b2_ref[0])                         # (TN, 1)

    # Pack scores into a zero-padded logit column -> one lane-dense bf16 store.
    col = lax.broadcasted_iota(jnp.int32, logits.shape, 1)
    out_ref[...] = jnp.where(col == score_col, s, logits).astype(out_ref.dtype)


def fused_selector_temporal(x, ncentroid, t_abn, t_desc_abn, logit_scale,
                            temporal_params, *, concat_features,
                            block_n=None):
    """Returns (logits (N, C_abn) bf16, scores (N,) f32)."""
    n, d = x.shape
    c_abn = t_abn.shape[0]
    e = temporal_params["w1x"].shape[1]

    # Pad class dim to a full lane width; one extra pad column carries the score.
    cpad = _round_up(max(c_abn + 1, 8), 128)
    epad = _round_up(max(e, 8), 128)
    assert c_abn < cpad

    # Snippet tile: large tiles amortize the ~0.35 us per-grid-step overhead and
    # keep the kernel near the HBM roofline.  At the 1024-row default and
    # D<=768: f32 x tile (~3 MiB) x2 bufs + bf16 out x2 + constants stay well
    # under the scoped limit and under v7x's 64 MiB physical VMEM.
    if block_n is None:
        block_n = 1024
    block_n = _round_up(max(8, min(block_n, _round_up(n, 8))), 8)
    # Keep >=2 tiles so the "parallel" grid axis can occupy both v7x TensorCores.
    if n > 8 and pl.cdiv(n, block_n) < 2:
        block_n = _round_up(pl.cdiv(n, 2), 8)
    grid = (pl.cdiv(n, block_n),)  # ragged tail handled by Pallas block padding

    # --- one-time JAX-side prep of (tiny) constant operands ------------------
    def prep_bank(t):
        tf = t.astype(jnp.float32)
        tf = tf / jnp.linalg.norm(tf, axis=-1, keepdims=True)
        tf = jnp.float32(logit_scale) * tf
        return jnp.pad(tf, ((0, cpad - c_abn), (0, 0)))       # (cpad, D)

    w1x = jnp.pad(temporal_params["w1x"].astype(jnp.float32),
                  ((0, 0), (0, epad - e)))                    # (D, epad)
    # Combined RHS: [learned bank | desc bank | W1_x]  (D, 2*cpad + epad) bf16.
    wcat = jnp.concatenate(
        [prep_bank(t_abn).T, prep_bank(t_desc_abn).T, w1x],
        axis=1).astype(jnp.bfloat16)

    w1l_src = temporal_params.get("w1l")
    if w1l_src is None:
        w1l_src = jnp.zeros((c_abn, e), jnp.float32)
    w1l = jnp.pad(w1l_src.astype(jnp.bfloat16),
                  ((0, cpad - c_abn), (0, epad - e)))         # (cpad, epad)
    b1 = jnp.pad(temporal_params["b1"].reshape(1, e).astype(jnp.float32),
                 ((0, 0), (0, epad - e)))                     # (1, epad)
    w2 = jnp.pad(temporal_params["w2"].reshape(1, e).astype(jnp.float32),
                 ((0, 0), (0, epad - e)))                     # (1, epad)
    b2 = temporal_params["b2"].reshape(1).astype(jnp.float32)

    nc2d = ncentroid.reshape(1, d).astype(jnp.float32)

    kernel = functools.partial(_fused_kernel, cpad=cpad, score_col=c_abn,
                               concat_features=bool(concat_features))
    bcast = lambda i: (0, 0)

    itemsize = jnp.dtype(x.dtype).itemsize
    cost = pl.CostEstimate(
        flops=2 * n * d * (2 * cpad + epad)
              + (2 * n * cpad * epad if concat_features else 0),
        transcendentals=2 * n,  # rsqrt + sigmoid per snippet
        bytes_accessed=n * d * itemsize + n * cpad * 2
                       + d * (2 * cpad + epad) * 2 + cpad * epad * 2)

    combined = pl.pallas_call(
        kernel,
        grid=grid,
        in_specs=[
            pl.BlockSpec((block_n, d), lambda i: (i, 0)),     # x tile, stored dtype
            pl.BlockSpec((1, d), bcast),                      # ncentroid
            pl.BlockSpec((d, 2 * cpad + epad), bcast),        # text banks + W1_x
            pl.BlockSpec((cpad, epad), bcast),                # W1_logits
            pl.BlockSpec((1, epad), bcast),                   # b1
            pl.BlockSpec((1, epad), bcast),                   # w2 (row)
            pl.BlockSpec(memory_space=pltpu.MemorySpace.SMEM),  # b2 scalar
        ],
        out_specs=pl.BlockSpec((block_n, cpad), lambda i: (i, 0)),
        out_shape=jax.ShapeDtypeStruct((n, cpad), jnp.bfloat16),
        compiler_params=pltpu.CompilerParams(
            dimension_semantics=("parallel",),
            vmem_limit_bytes=48 * 1024 * 1024),
        cost_estimate=cost,
    )(x, nc2d, wcat, w1l, b1, w2, b2)

    logits = combined[:, :c_abn]                              # bf16 (N, C_abn)
    scores = combined[:, c_abn].astype(jnp.float32)           # (N,)
    return logits, scores


# ----------------------------------------------------------------------------
# Full forward (train mode, load_from_features=True)
# ----------------------------------------------------------------------------
def anomaly_clip_forward(image_features, labels, ncentroid, text_features,
                         text_prompt_desc, temporal_params, *,
                         num_segments, seg_length, normal_id,
                         num_topk, num_bottomk, logit_scale,
                         concat_features=True, block_n=None):
    b, ncrops, t, d = image_features.shape
    assert t == num_segments * seg_length
    del labels  # TODO(synk): labels only feed the unreproducible select_topk path.

    # torch.squeeze + view(-1, d)
    x = image_features.reshape(-1, d)

    # Selector uses only the abnormal (non-normal) class prompts
    # (len(classnames) - 1 of them, matching `additional_concat`).
    num_classes = text_features.shape[0]
    abn_idx = jnp.array([i for i in range(num_classes) if i != normal_id],
                        dtype=jnp.int32)
    t_abn = text_features[abn_idx]
    t_desc_abn = text_prompt_desc[abn_idx]

    # --- fused Pallas kernel: logits = max(sim(learned), sim(desc)) and
    #     snippet scores from the temporal head on concat(logits, x - ncentroid)
    logits, scores = fused_selector_temporal(
        x, ncentroid, t_abn, t_desc_abn, logit_scale, temporal_params,
        concat_features=concat_features, block_n=block_n)

    # --- top-k / bottom-k snippet selection (glue)
    # TODO(synk): exact SelectorModel.select_topk/select_bottomk and the
    # stochastic generate_mask dropout are not reproducible from the given
    # code; a deterministic per-snippet max-over-class criterion is used.
    c_abn = logits.shape[-1]
    logits_seg = logits.reshape(b * ncrops, num_segments * seg_length, c_abn)
    snippet_score = jnp.max(logits_seg, axis=-1)                    # (B, T)
    _, idx_topk = lax.top_k(snippet_score, num_topk)                # (B, K)
    logits_topk = jnp.take_along_axis(logits_seg, idx_topk[..., None], axis=1)
    _, idx_bottomk = lax.top_k(-snippet_score, num_bottomk)
    # logits_bottomk is not returned by the reference forward -> gather dropped.

    nb = idx_topk.shape[0]
    idx_topk_abn, idx_topk_nor = idx_topk[: nb // 2], idx_topk[nb // 2:]
    idx_bottomk_abn = idx_bottomk[: nb // 2]

    logits_flat = logits_seg.reshape(-1, c_abn)
    logits_topk = logits_topk.reshape(-1, c_abn)

    return (logits_flat, logits_topk, scores.reshape(-1),
            idx_topk_abn, idx_topk_nor, idx_bottomk_abn)


# ----------------------------------------------------------------------------
# Main
# ----------------------------------------------------------------------------
if __name__ == "__main__":
    # Small config consistent with the module's __init__.
    b, ncrops = 2, 1
    num_segments, seg_length = 32, 2
    embedding_dim = 64
    num_classes, normal_id = 5, 0
    emb_size = 32
    num_topk, num_bottomk = 3, 3
    concat_features = True
    logit_scale = float(jnp.exp(jnp.log(1.0 / 0.07)))  # CLIP logit_scale.exp()

    t = num_segments * seg_length
    additional_concat = num_classes - 1
    input_size = embedding_dim + additional_concat * int(concat_features)

    key = jax.random.PRNGKey(0)
    ks = jax.random.split(key, 10)

    image_features = jax.random.normal(
        ks[0], (b, ncrops, t, embedding_dim), jnp.float32)
    labels = jnp.array([1, 0], dtype=jnp.int32)  # abnormal video, normal video
    ncentroid = 0.1 * jax.random.normal(ks[1], (embedding_dim,), jnp.float32)

    # Deterministic stand-ins for the CLIP text encoder outputs.
    text_features = jax.random.normal(
        ks[2], (num_classes, embedding_dim), jnp.float32)
    text_prompt_desc = jax.random.normal(
        ks[3], (num_classes, embedding_dim), jnp.float32)

    # Temporal model (reduced scoring head) parameters; W1 is split so the
    # kernel can fuse the feature concat into two matmuls.
    scale1 = 1.0 / jnp.sqrt(jnp.float32(input_size))
    scale2 = 1.0 / jnp.sqrt(jnp.float32(emb_size))
    temporal_params = {
        "w1l": scale1 * jax.random.normal(
            ks[4], (additional_concat, emb_size), jnp.float32),
        "w1x": scale1 * jax.random.normal(
            ks[5], (embedding_dim, emb_size), jnp.float32),
        "b1": jnp.zeros((1, emb_size), jnp.float32),
        "w2": scale2 * jax.random.normal(ks[6], (emb_size, 1), jnp.float32),
        "b2": jnp.zeros((1, 1), jnp.float32),
    }

    fwd = functools.partial(
        anomaly_clip_forward,
        num_segments=num_segments, seg_length=seg_length,
        normal_id=normal_id, num_topk=num_topk, num_bottomk=num_bottomk,
        logit_scale=logit_scale, concat_features=concat_features,
        block_n=None)  # default tiling: N=128 -> 2 tiles of 64 (pipelined/megacore)

    out = fwd(image_features, labels, ncentroid, text_features,
              text_prompt_desc, temporal_params)
    out = jax.block_until_ready(out)

    logits_o, logits_topk_o, scores_o, it_abn, it_nor, ib_abn = out
    n_total = b * ncrops * t
    assert logits_o.shape == (n_total, additional_concat)
    assert logits_topk_o.shape == (b * ncrops * num_topk, additional_concat)
    assert scores_o.shape == (n_total,)
    assert it_abn.shape == (b * ncrops // 2, num_topk)
    assert it_nor.shape == (b * ncrops - b * ncrops // 2, num_topk)
    assert ib_abn.shape == (b * ncrops // 2, num_bottomk)
    assert bool(jnp.all(jnp.isfinite(logits_o.astype(jnp.float32))))
    assert bool(jnp.all((scores_o >= 0.0) & (scores_o <= 1.0)))

    print("KERNEL_OK")
</pallas_src>

<mosaic_0001>
module attributes {stable_mosaic.version = 11 : i64} {
  func.func @_fused_kernel(%arg0: i32, %arg1: memref<64x64xf32, #tpu.memory_space<vmem>>, %arg2: memref<1x64xf32, #tpu.memory_space<vmem>>, %arg3: memref<64x384xbf16, #tpu.memory_space<vmem>>, %arg4: memref<128x128xbf16, #tpu.memory_space<vmem>>, %arg5: memref<1x128xf32, #tpu.memory_space<vmem>>, %arg6: memref<1x128xf32, #tpu.memory_space<vmem>>, %arg7: memref<1xf32, #tpu.memory_space<smem>>, %arg8: memref<64x128xbf16, #tpu.memory_space<vmem>>) attributes {dimension_semantics = [#tpu.dimension_semantics<parallel>], iteration_bounds = array<i64: 2>, scalar_prefetch = 0 : i64, scratch_operands = 0 : i64, tpu.core_type = #tpu.core_type<tc>, window_params = [{transform_indices = @transform_0, window_bounds = array<i64: 64, 64>}, {pipeline_mode = #tpu.pipeline_mode<synchronous>, transform_indices = @transform_1, window_bounds = array<i64: 1, 64>}, {pipeline_mode = #tpu.pipeline_mode<synchronous>, transform_indices = @transform_2, window_bounds = array<i64: 64, 384>}, {pipeline_mode = #tpu.pipeline_mode<synchronous>, transform_indices = @transform_3, window_bounds = array<i64: 128, 128>}, {pipeline_mode = #tpu.pipeline_mode<synchronous>, transform_indices = @transform_4, window_bounds = array<i64: 1, 128>}, {pipeline_mode = #tpu.pipeline_mode<synchronous>, transform_indices = @transform_5, window_bounds = array<i64: 1, 128>}, {transform_indices = @transform_6, window_bounds = array<i64: 1>}, {transform_indices = @transform_7, window_bounds = array<i64: 64, 128>}]} {
    %c0 = arith.constant 0 : index
    %c0_0 = arith.constant 0 : index
    %0 = vector.load %arg1[%c0, %c0_0] : memref<64x64xf32, #tpu.memory_space<vmem>>, vector<64x64xf32>
    %c0_1 = arith.constant 0 : index
    %c0_2 = arith.constant 0 : index
    %1 = vector.load %arg2[%c0_1, %c0_2] : memref<1x64xf32, #tpu.memory_space<vmem>>, vector<1x64xf32>
    %2 = vector.broadcast %1 : vector<1x64xf32> to vector<64x64xf32>
    %3 = arith.subf %0, %2 : vector<64x64xf32>
    %4 = arith.mulf %3, %3 : vector<64x64xf32>
    %cst = arith.constant dense<0.000000e+00> : vector<64xf32>
    %5 = vector.multi_reduction <add>, %4, %cst [1] : vector<64x64xf32> to vector<64xf32>
    %6 = vector.shape_cast %5 : vector<64xf32> to vector<64x1xf32>
    %cst_3 = arith.constant 9.99999996E-13 : f32
    %7 = vector.broadcast %cst_3 : f32 to vector<64x1xf32>
    %8 = arith.addf %6, %7 : vector<64x1xf32>
    %9 = math.rsqrt %8 : vector<64x1xf32>
    %10 = arith.truncf %3 : vector<64x64xf32> to vector<64x64xbf16>
    %c0_4 = arith.constant 0 : index
    %c0_5 = arith.constant 0 : index
    %11 = vector.load %arg3[%c0_4, %c0_5] : memref<64x384xbf16, #tpu.memory_space<vmem>>, vector<64x384xbf16>
    %cst_6 = arith.constant dense<0.000000e+00> : vector<64x384xf32>
    %12 = tpu.matmul %10, %11, %cst_6 {dimension_numbers = #tpu.dot_dimension_numbers<[1], [0], [0], [1], [0, 0, 1, 1], [], []>} : vector<64x64xbf16>, vector<64x384xbf16>, vector<64x384xf32> -> vector<64x384xf32>
    %13 = vector.extract_strided_slice %12 {offsets = [0, 0], sizes = [64, 256], strides = [1, 1]} : vector<64x384xf32> to vector<64x256xf32>
    %14 = vector.broadcast %9 : vector<64x1xf32> to vector<64x256xf32>
    %15 = arith.mulf %13, %14 : vector<64x256xf32>
    %16 = vector.extract_strided_slice %15 {offsets = [0, 0], sizes = [64, 128], strides = [1, 1]} : vector<64x256xf32> to vector<64x128xf32>
    %17 = vector.extract_strided_slice %15 {offsets = [0, 128], sizes = [64, 128], strides = [1, 1]} : vector<64x256xf32> to vector<64x128xf32>
    %18 = arith.maximumf %16, %17 : vector<64x128xf32>
    %19 = vector.extract_strided_slice %12 {offsets = [0, 256], sizes = [64, 128], strides = [1, 1]} : vector<64x384xf32> to vector<64x128xf32>
    %20 = arith.truncf %18 : vector<64x128xf32> to vector<64x128xbf16>
    %c0_7 = arith.constant 0 : index
    %c0_8 = arith.constant 0 : index
    %21 = vector.load %arg4[%c0_7, %c0_8] : memref<128x128xbf16, #tpu.memory_space<vmem>>, vector<128x128xbf16>
    %cst_9 = arith.constant dense<0.000000e+00> : vector<64x128xf32>
    %22 = tpu.matmul %20, %21, %cst_9 {dimension_numbers = #tpu.dot_dimension_numbers<[1], [0], [0], [1], [0, 0, 1, 1], [], []>} : vector<64x128xbf16>, vector<128x128xbf16>, vector<64x128xf32> -> vector<64x128xf32>
    %23 = arith.addf %19, %22 : vector<64x128xf32>
    %c0_10 = arith.constant 0 : index
    %c0_11 = arith.constant 0 : index
    %24 = vector.load %arg5[%c0_10, %c0_11] : memref<1x128xf32, #tpu.memory_space<vmem>>, vector<1x128xf32>
    %25 = vector.broadcast %24 : vector<1x128xf32> to vector<64x128xf32>
    %26 = arith.addf %23, %25 : vector<64x128xf32>
    %cst_12 = arith.constant 0.000000e+00 : f32
    %27 = vector.broadcast %cst_12 : f32 to vector<64x128xf32>
    %28 = arith.maximumf %26, %27 : vector<64x128xf32>
    %c0_13 = arith.constant 0 : index
    %c0_14 = arith.constant 0 : index
    %29 = vector.load %arg6[%c0_13, %c0_14] : memref<1x128xf32, #tpu.memory_space<vmem>>, vector<1x128xf32>
    %30 = vector.broadcast %29 : vector<1x128xf32> to vector<64x128xf32>
    %31 = arith.mulf %28, %30 : vector<64x128xf32>
    %cst_15 = arith.constant dense<0.000000e+00> : vector<64xf32>
    %32 = vector.multi_reduction <add>, %31, %cst_15 [1] : vector<64x128xf32> to vector<64xf32>
    %33 = vector.shape_cast %32 : vector<64xf32> to vector<64x1xf32>
    %c0_16 = arith.constant 0 : index
    %34 = memref.load %arg7[%c0_16] : memref<1xf32, #tpu.memory_space<smem>>
    %35 = vector.broadcast %34 : f32 to vector<64x1xf32>
    %36 = arith.addf %33, %35 : vector<64x1xf32>
    %37 = arith.negf %36 : vector<64x1xf32>
    %38 = math.exp %37 : vector<64x1xf32>
    %cst_17 = arith.constant 1.000000e+00 : f32
    %39 = vector.broadcast %cst_17 : f32 to vector<64x1xf32>
    %40 = arith.addf %39, %38 : vector<64x1xf32>
    %41 = arith.divf %39, %40 : vector<64x1xf32>
    %42 = tpu.iota {dimensions = array<i32: 1>} : vector<64x128xi32>
    %c4_i32 = arith.constant 4 : i32
    %43 = vector.broadcast %c4_i32 : i32 to vector<64x128xi32>
    %44 = arith.cmpi eq, %42, %43 : vector<64x128xi32>
    %45 = vector.shape_cast %41 : vector<64x1xf32> to vector<64x1xf32>
    %46 = vector.broadcast %45 : vector<64x1xf32> to vector<64x128xf32>
    %47 = arith.select %44, %46, %18 : vector<64x128xi1>, vector<64x128xf32>
    %48 = arith.truncf %47 : vector<64x128xf32> to vector<64x128xbf16>
    %c0_18 = arith.constant 0 : index
    %c0_19 = arith.constant 0 : index
    %49 = vector.load %arg8[%c0_18, %c0_19] : memref<64x128xbf16, #tpu.memory_space<vmem>>, vector<64x128xbf16>
    tpu.vector_store %arg8[%c0_18, %c0_19], %48 {strides = array<i32>} : memref<64x128xbf16, #tpu.memory_space<vmem>>, vector<64x128xbf16>,
    return
  }
  func.func @transform_0(%arg0: i32) -> (i32, i32) {
    %c0_i32 = arith.constant 0 : i32
    %c0_i32_0 = arith.constant 0 : i32
    return %arg0, %c0_i32 : i32, i32
  }
  func.func @transform_1(%arg0: i32) -> (i32, i32) {
    %c0_i32 = arith.constant 0 : i32
    %c0_i32_0 = arith.constant 0 : i32
    %c0_i32_1 = arith.constant 0 : i32
    return %c0_i32, %c0_i32_0 : i32, i32
  }
  func.func @transform_2(%arg0: i32) -> (i32, i32) {
    %c0_i32 = arith.constant 0 : i32
    %c0_i32_0 = arith.constant 0 : i32
    %c0_i32_1 = arith.constant 0 : i32
    return %c0_i32, %c0_i32_0 : i32, i32
  }
  func.func @transform_3(%arg0: i32) -> (i32, i32) {
    %c0_i32 = arith.constant 0 : i32
    %c0_i32_0 = arith.constant 0 : i32
    %c0_i32_1 = arith.constant 0 : i32
    return %c0_i32, %c0_i32_0 : i32, i32
  }
  func.func @transform_4(%arg0: i32) -> (i32, i32) {
    %c0_i32 = arith.constant 0 : i32
    %c0_i32_0 = arith.constant 0 : i32
    %c0_i32_1 = arith.constant 0 : i32
    return %c0_i32, %c0_i32_0 : i32, i32
  }
  func.func @transform_5(%arg0: i32) -> (i32, i32) {
    %c0_i32 = arith.constant 0 : i32
    %c0_i32_0 = arith.constant 0 : i32
    %c0_i32_1 = arith.constant 0 : i32
    return %c0_i32, %c0_i32_0 : i32, i32
  }
  func.func @transform_6(%arg0: i32) -> i32 {
    %c0_i32 = arith.constant 0 : i32
    %c0_i32_0 = arith.constant 0 : i32
    return %c0_i32 : i32
  }
  func.func @transform_7(%arg0: i32) -> (i32, i32) {
    %c0_i32 = arith.constant 0 : i32
    %c0_i32_0 = arith.constant 0 : i32
    return %arg0, %c0_i32 : i32, i32
  }
}

</mosaic_0001>

<bundles_post_ra>
// kernel: tpu_custom_call.1
= control target key start
LH: loop header
LB: loop body
LE: loop exit
PB: predicated region body
PF: predicated region fallthrough
CT: control target
= control target key end

     0   :  { %s1766_s0 = inlined_call_operand.vmem [shape: f32[128,64], index: 0, kind: input, shape index: {}]   ;;  %s1767_s1 = inlined_call_operand.vmem [shape: f32[1,64], index: 1, kind: input, shape index: {}]   ;;  %s1768_s2 = inlined_call_operand.vmem [shape: bf16[64,384], index: 2, kind: input, shape index: {}]   ;;  %s1769_s3 = inlined_call_operand.vmem [shape: bf16[128,128], index: 3, kind: input, shape index: {}]   ;;  %s1770_s4 = inlined_call_operand.vmem [shape: f32[1,128], index: 4, kind: input, shape index: {}]   ;;  %s1771_s5 = inlined_call_operand.vmem [shape: f32[1,128], index: 5, kind: input, shape index: {}]   ;;  %s1772_s6 = inlined_call_operand.<no memory space> [shape: f32[1], index: 6, kind: input, shape index: {}]   ;;  %s1773_s7 = inlined_call_operand.hbm [shape: bf16[128,128], index: 7, kind: output, shape index: {}]  }
   0x1   :  { %12 = sst [smem:[#allocation2]] %s1772_s6 }
   0x2   :  { %13 = vsyncpa [#allocation4], 0 }
   0x3   :  { %15 = vsyncpa [#allocation4 + $0x1], 0  ;;  %s1407_s26 = smov 0   ;;  %s1409_s27 = smov 0  }
   0x4   :  { %s1411_s28 = smov 0   ;;  %s1413_s29 = smov 0  }
   0x5 LB: > { %s1428_s6 = sadd.s32 4294967295, %s1360_s29   ;;  %s1050_s30 = sadd.s32 4294967294, %s1360_s29   ;;  %s1360_s29 = sphi %s1413_s29, %s1783_s29   ;;  %s1356_s28 = sphi %s1411_s28, %s1782_s28   ;;  %s1352_s27 = sphi %s1409_s27, %s1781_s27   ;;  %s1348_s26 = sphi %s1407_s26, %s1780_s26  }
   0x6   : > { %s1432_s8 = sadd.s32 1, %s1360_s29   ;;  %s180_s9 = sadd.s32 1, %s1356_s28 }
   0x7   : > { %s177_s10 = ssub.s32 %s1360_s29, %s1432_s8  ;;  %p190_p0 = scmp.ne.s32.totalorder %s1356_s28, %s1352_s27 }
   0x8   : > { %p178_p1 = scmp.eq.s32.totalorder %s177_s10, 0  ;;  %p191_p2 = scmp.eq.s32.totalorder %s1428_s6, 1 }
   0x9   : > { %p196_p3 = scmp.ne.s32.totalorder %s1352_s27, %s1348_s26  ;;  %p197_p4 = scmp.eq.s32.totalorder %s1050_s30, 1 }
   0xa   : > { %s1443_s11 = scalar_select %p178_p1, %s1356_s28, %s180_s9  }
   0xb   : > { %p1445_p5 = por %p191_p2, %p190_p0  ;;  %p1449_p6 = por %p197_p4, %p196_p3 }
   0xc   : > { %p1053_p7 = scmp.ge.s32.totalorder %s1360_s29, 1  ;;  %p242_p8 = scmp.lt.s32.totalorder %s1360_s29, 3 }
   0xe   : > { %p243_p9 = pnand %p1053_p7, %p242_p8 }
   0xf   : > { %s1055_s19 = sshll.u32 (!%p243_p9), %s1428_s6, 3  ;;  %s783_s14 = sld [smem:[#allocation2]] (!%p243_p9) }
  0x10   : > { %246 = sbr.rel (%p243_p9) target bundleno = 533 (0x215), region = 48  ;;  %p275_p10 = scmp.lt.s32.totalorder (!%p243_p9), %s1055_s19, 15 }
  0x11   : > { %s1182_s18 = sshll.u32 (!%p243_p9), %s1428_s6, 5  ;;  %s1318_s10 = scalar_lea.hbm (!%p243_p9), %s1773_s7, 64 }
  0x12   : > { %s984_s22 = scalar_lea.hbm (!%p243_p9), %s1773_s7, %s1182_s18 }
  0x15   : > { %v1095_v0 = vld [vmem:[%s1768_s2 + $0x48] sm:$0xf]  ;;  %v1172_v1 = vld [vmem:[%s1768_s2 + $0x50] sm:$0xf0]  ;;  %v1171_v2 = vld [vmem:[%s1768_s2 + $0x4c] sm:$0xf] }
  0x16   : > { %v1096_v3 = vor.u32 %v1172_v1, %v1095_v0  ;;  %v1097_v4 = vld [vmem:[%s1768_s2 + $0x54] sm:$0xf0]  ;;  %v1083_v5 = vld [vmem:[%s1768_s2 + $0x30] sm:$0xf]  ;;  %v1169_v6 = vld [vmem:[%s1768_s2 + $0x38] sm:$0xf0] }
  0x17   : > { %v1100_v7 = vor.u32 %v1171_v2, %v1097_v4  ;;  %v1168_v8 = vld [vmem:[%s1768_s2 + $0x34] sm:$0xf]  ;;  %v1085_v9 = vld [vmem:[%s1768_s2 + $0x3c] sm:$0xf0]  ;;  %v1084_v10 = vor.u32 %v1169_v6, %v1083_v5  ;;  %v1071_v11 = vld [vmem:[%s1768_s2 + $0x18] sm:$0xf] }
  0x18   : > { %523 = vmatpush.bf16.msra.mxu0 %v1096_v3  ;;  %v1088_v12 = vor.u32 %v1168_v8, %v1085_v9  ;;  %v1166_v13 = vld [vmem:[%s1768_s2 + $0x20] sm:$0xf0]  ;;  %v1165_v14 = vld [vmem:[%s1768_s2 + $0x1c] sm:$0xf]  ;;  %v1073_v15 = vld [vmem:[%s1768_s2 + $0x24] sm:$0xf0] }
  0x19   : > { %552 = vmatpush.bf16.msra.mxu1 %v1100_v7  ;;  %v1072_v16 = vor.u32 %v1166_v13, %v1071_v11  ;;  %s1785_s19 = smov (!%p275_p10, %s1055_s19), 15  ;;  %v1076_v17 = vor.u32 %v1165_v14, %v1073_v15  ;;  %v1247_v18 = vld [vmem:[%s1767_s1] ss:$0 sm:$0xff]  ;;  %v1163_v20 = vld [vmem:[%s1768_s2 + $0x8] sm:$0xf0]  ;;  %vm310_vm0 = vcmask 523264  }
  0x1a   : > { %v1059_v19 = vld [vmem:[%s1768_s2] sm:$0xf]  ;;  %s1056_s15 = sshll.u32 %s1785_s19, 3  ;;  %v1162_v21 = vld [vmem:[%s1768_s2 + $0x4] sm:$0xf]  ;;  %v1181_v61 = vld [vmem:[%s1769_s3 + $0x38] sm:$0xff] }
  0x1b   : > { %v1061_v22 = vld [vmem:[%s1768_s2 + $0xc] sm:$0xf0]  ;;  %s1510_s23 = scalar_lea.vmem %s1766_s0, %s1056_s15  ;;  %v1060_v25 = vor.u32 %v1163_v20, %v1059_v19  ;;  %698 = vmatpush.bf16.msra.mxu3 %v1181_v61  ;;  %v1173_v0 = vld [vmem:[%s1768_s2 + $0x58] sm:$0xf0]  ;;  %v1179_v2 = vld [vmem:[%s1769_s3 + $0x28] sm:$0xff]  ;;  %s271_s15 = sand.u32 1, %s1352_s27  }
  0x1c   : > { %524 = vmatpush.bf16.msra.mxu0 %v1084_v10  ;;  %v282_v23 = vld [vmem:[%s1510_s23] sm:$0xff]  ;;  %v284_v24 = vld [vmem:[%s1510_s23 + $0x10] sm:$0xff]  ;;  %v283_v26 = vld [vmem:[%s1510_s23 + $0x8] sm:$0xff]  ;;  %v1064_v29 = vor.u32 %v1162_v21, %v1061_v22  ;;  %s1054_s16 = sshll.u32 %s271_s15, 5  ;;  %s973_s19 = scalar_lea.sflag [#allocation4], %s271_s15 }
  0x1d   : > { %553 = vmatpush.bf16.msra.mxu1 %v1088_v12  ;;  %v294_v27 = vsub.f32 %v282_v23, %v1247_v18  ;;  %v296_v28 = vsub.f32 %v284_v24, %v1247_v18  ;;  %v295_v30 = vsub.f32 %v283_v26, %v1247_v18  ;;  %v285_v31 = vld [vmem:[%s1510_s23 + $0x18] sm:$0xff]  ;;  %v286_v32 = vld [vmem:[%s1510_s23 + $0x20] sm:$0xff]  ;;  %v287_v33 = vld [vmem:[%s1510_s23 + $0x28] sm:$0xff]  ;;  %s1690_s17 = scalar_lea.vmem [#allocation3], %s1054_s16 }
  0x1e   : > { %v298_v34 = vsub.f32 %v286_v32, %v1247_v18  ;;  %v297_v38 = vsub.f32 %v285_v31, %v1247_v18  ;;  %v299_v40 = vsub.f32 %v287_v33, %v1247_v18  ;;  %v289_v47 = vld [vmem:[%s1510_s23 + $0x38] sm:$0xff]  ;;  %v288_v48 = vld [vmem:[%s1510_s23 + $0x30] sm:$0xff]  ;;  %v1170_v4 = vld [vmem:[%s1768_s2 + $0x40] sm:$0xf0]  ;;  %s985_s6 = sshll.u32 %s1690_s17, 4  ;;  %s987_s23 = sshll.u32 %s984_s22, 4  ;;  %s986_s6 = int_to_ptr.vmem [resolvable:$true] %s985_s6  ;;  %s988_s23 = int_to_ptr.hbm [resolvable:$true] %s987_s23 }
  0x1f   : > { %v302_v35 = vmul.f32 %v294_v27, %v294_v27  ;;  %v304_v36 = vmul.f32 %v296_v28, %v296_v28  ;;  %v1518_v37 = vpack.c.bf16 %v295_v30, %v294_v27  ;;  %v303_v44 = vmul.f32 %v295_v30, %v295_v30  ;;  %v1180_v62 = vld [vmem:[%s1769_s3 + $0x30] sm:$0xff]  ;;  %v1091_v3 = vld [vmem:[%s1768_s2 + $0x38] sm:$0xf]  ;;  %v1178_v6 = vld [vmem:[%s1769_s3 + $0x20] sm:$0xff]  ;;  %s1312_s24 = sshra.s32 %s988_s23, 4  ;;  %s1313_s24 = int_to_ptr.hbm [resolvable:$true] %s1312_s24 }
  0x20   : > { %525 = vmatpush.bf16.msra.mxu0 %v1072_v16  ;;  %v306_v39 = vmul.f32 %v298_v34, %v298_v34  ;;  %v305_v45 = vmul.f32 %v297_v38, %v297_v38  ;;  %v307_v46 = vmul.f32 %v299_v40, %v299_v40  ;;  %v301_v51 = vsub.f32 %v289_v47, %v1247_v18  ;;  %v1103_v63 = vld [vmem:[%s1768_s2 + $0x50] sm:$0xf]  ;;  %v1079_v7 = vld [vmem:[%s1768_s2 + $0x20] sm:$0xf]  ;;  %v1167_v8 = vld [vmem:[%s1768_s2 + $0x28] sm:$0xf0]  ;;  %p1319_p0 = scmp.lt.s32.totalorder %s1313_s24, %s1773_s7 }
  0x21   : > { %554 = vmatpush.bf16.msra.mxu1 %v1076_v17  ;;  %v311_v41 = vsel %vm310_vm0, %v302_v35, 0.0  ;;  %v317_v42 = vsel %vm310_vm0, %v304_v36, 0.0  ;;  %v314_v49 = vsel %vm310_vm0, %v303_v44, 0.0  ;;  %v300_v52 = vsub.f32 %v288_v48, %v1247_v18  ;;  %699 = vmatpush.bf16.msra.mxu3 %v1180_v62  ;;  %v1177_v10 = vld [vmem:[%s1769_s3 + $0x18] sm:$0xff]  ;;  %v1067_v11 = vld [vmem:[%s1768_s2 + $0x8] sm:$0xf] }
  0x22   : > { %312 = vadd.xlane.f32.xlu0 %v311_v41  ;;  %318 = vadd.xlane.f32.xlu1 %v317_v42  ;;  %v323_v43 = vsel %vm310_vm0, %v306_v39, 0.0  ;;  %v320_v50 = vsel %vm310_vm0, %v305_v45, 0.0  ;;  %v326_v53 = vsel %vm310_vm0, %v307_v46, 0.0  ;;  %v309_v54 = vmul.f32 %v301_v51, %v301_v51  ;;  %v1164_v12 = vld [vmem:[%s1768_s2 + $0x10] sm:$0xf0]  ;;  %v1175_v15 = vld [vmem:[%s1769_s3 + $0x8] sm:$0xff] }
  0x23   : > { %324 = vadd.xlane.f32.xlu2 %v323_v43  ;;  %v308_v55 = vmul.f32 %v300_v52, %v300_v52  ;;  %v424_v56 = vpack.c.bf16 %v297_v38, %v296_v28  ;;  %v1536_v59 = vpack.c.bf16 %v299_v40, %v298_v34  ;;  %v1542_v60 = vpack.c.bf16 %v301_v51, %v300_v52  ;;  %v1176_v14 = vld [vmem:[%s1769_s3 + $0x10] sm:$0xff]  ;;  %v1174_v16 = vld [vmem:[%s1769_s3] sm:$0xff]  ;;  %s1314_s25 = scalar_lea.hbm %s1313_s24, 32 }
  0x24   : > { %526 = vmatpush.bf16.msra.mxu0 %v1060_v25  ;;  %v332_v57 = vsel %vm310_vm0, %v309_v54, 0.0  ;;  %v1104_v1 = vor.u32 %v1173_v0, %v1103_v63  ;;  %v1092_v5 = vor.u32 %v1170_v4, %v1091_v3  ;;  %v1080_v9 = vor.u32 %v1167_v8, %v1079_v7  ;;  %p1315_p11 = scmp.ne.s32.totalorder %s1313_s24, %s1314_s25  ;;  %p1320_p1 = scmp.lt.s32.totalorder %s1318_s10, %s1314_s25 }
  0x25   : > { %555 = vmatpush.bf16.msra.mxu1 %v1064_v29  ;;  %v329_v58 = vsel %vm310_vm0, %v308_v55, 0.0  ;;  %700 = vmatpush.bf16.msra.mxu3 %v1179_v2  ;;  %v1068_v13 = vor.u32 %v1164_v12, %v1067_v11 }
  0x26   : > { %581 = vmatpush.bf16.msra.mxu2 %v1104_v1  ;;  %p1316_p12 = pnand %p1315_p11, %p1445_p5  ;;  %p1321_p2 = por %p1320_p1, %p1319_p0 }
  0x27   : > { %1105 = vmatmul.msk.bf16.vlgmr.msra.gmra.mxu0 %vm310_vm0, %v1518_v37 }
  0x28   : > { %1109 = vmatmul.msk.bf16.vlgmr.msra.gmra.mxu1 %vm310_vm0, %v1518_v37  ;;  %p1317_p13 = pneg %p1316_p12 }
  0x29   : > { %701 = vmatpush.bf16.msra.mxu3 %v1178_v6 }
  0x2a   : > { %315 = vadd.xlane.f32.xlu0 %v314_v49  ;;  %321 = vadd.xlane.f32.xlu1 %v320_v50  ;;  %p1322_p3 = pnand %p1321_p2, %p1317_p13 }
  0x2b   : > { %327 = vadd.xlane.f32.xlu2 %v326_v53  ;;  %582 = vmatpush.bf16.msra.mxu2 %v1092_v5 }
  0x2d   : > { %702 = vmatpush.bf16.msra.mxu3 %v1177_v10 }
  0x2f   : > { %583 = vmatpush.bf16.msra.mxu2 %v1080_v9 }
  0x31   : > { %703 = vmatpush.bf16.msra.mxu3 %v1176_v14 }
  0x32   : > { %333 = vadd.xlane.f32.xlu1 %v332_v57  ;;  %330 = vadd.xlane.f32.xlu0 %v329_v58 }
  0x33   : > { %584 = vmatpush.bf16.msra.mxu2 %v1068_v13 }
  0x35   : > { %704 = vmatpush.bf16.msra.mxu3 %v1175_v15 }
  0x36   : > { %1113 = vmatmul.msk.bf16.vlgmr.msra.gmra.mxu2 %vm310_vm0, %v1518_v37 }
  0x37   : > { %1106 = vmatmul.msk.bf16.gmra.mxu0 %vm310_vm0, %v424_v56 }
  0x38   : > { %1110 = vmatmul.msk.bf16.gmra.mxu1 %vm310_vm0, %v424_v56 }
  0x39   : > { %705 = vmatpush.bf16.msra.mxu3 %v1174_v16 }
  0x46   : > { %1114 = vmatmul.msk.bf16.gmra.mxu2 %vm310_vm0, %v424_v56 }
  0x47   : > { %1107 = vmatmul.msk.bf16.gmra.mxu0 %vm310_vm0, %v1536_v59 }
  0x48   : > { %1111 = vmatmul.msk.bf16.gmra.mxu1 %vm310_vm0, %v1536_v59 }
  0x56   : > { %1115 = vmatmul.msk.bf16.gmra.mxu2 %vm310_vm0, %v1536_v59 }
  0x57   : > { %1108 = vmatmul.msk.bf16.gmra.mxu0 %vm310_vm0, %v1542_v60 }
  0x58   : > { %1112 = vmatmul.msk.bf16.gmra.mxu1 %vm310_vm0, %v1542_v60 }
  0x66   : > { %1116 = vmatmul.msk.bf16.gmra.mxu2 %vm310_vm0, %v1542_v60 }
  0x95   : > { %v313_v17 = vpop.xlane.xlu0 %312  ;;  %v319_v18 = vpop.xlane.xlu1 %318 }
  0x96   : > { %v335_v19 = vadd.f32 1e-12, %v313_v17  ;;  %v1598_v23 = vadd.f32 1e-12, %v319_v18  ;;  %v325_v27 = vpop.xlane.xlu2 %324 }
  0x97   : > { %v1612_v49 = vadd.f32 1e-12, %v325_v27 }
  0x98   : > { %1250 = vrsqrt.f32 %v335_v19  ;;  %vm349_vm2 = vweird.f32 %v335_v19  ;;  %vm369_vm9 = vweird.f32 %v1598_v23 }
  0x99   : > { %vm389_vm15 = vweird.f32 %v1612_v49 }
  0x9d   : > { %v316_v20 = vpop.xlane.xlu0 %315  ;;  %v322_v21 = vpop.xlane.xlu1 %321 }
  0x9e   : > { %v1251_v22 = vpop.eup %1250  ;;  %v336_v24 = vadd.f32 1e-12, %v316_v20  ;;  %v1600_v25 = vadd.f32 1e-12, %v322_v21  ;;  %v328_v42 = vpop.xlane.xlu2 %327 }
  0x9f   : > { %v344_v26 = vmul.f32 %v1251_v22, %v335_v19  ;;  %vm350_vm1 = vweird.f32 %v1251_v22  ;;  %v1610_v45 = vadd.f32 1e-12, %v328_v42 }
  0xa0   : > { %1252 = vrsqrt.f32 %v336_v24  ;;  %vm351_vm3 = vmor %vm349_vm2, %vm350_vm1  ;;  %vm359_vm5 = vweird.f32 %v336_v24  ;;  %vm379_vm7 = vweird.f32 %v1600_v25 }
  0xa1   : > { %v345_v29 = vmul.f32 %v1251_v22, %v344_v26  ;;  %1254 = vrsqrt.f32 %v1600_v25  ;;  %vm399_vm13 = vweird.f32 %v1610_v45 }
  0xa2   : > { %1256 = vrsqrt.f32 %v1598_v23 }
  0xa3   : > { %v346_v31 = vmul.f32 0.5, %v345_v29  ;;  %1258 = vrsqrt.f32 %v1610_v45 }
  0xa4   : > { %v528_v28 = vpop.f32.mrf.mxu0  ;;  %1260 = vrsqrt.f32 %v1612_v49 }
  0xa5   : > { %v557_v30 = vpop.f32.mrf.mxu1  ;;  %v347_v32 = vsub.f32 1.5, %v346_v31  ;;  %v334_v9 = vpop.xlane.xlu1 %333 }
  0xa6   : > { %v1253_v33 = vpop.eup %1252  ;;  %v331_v12 = vpop.xlane.xlu0 %330  ;;  %v342_v13 = vadd.f32 1e-12, %v334_v9 }
  0xa7   : > { %v1255_v34 = vpop.eup %1254  ;;  %v354_v35 = vmul.f32 %v1253_v33, %v336_v24  ;;  %v348_v40 = vmul.f32 %v1251_v22, %v347_v32  ;;  %vm360_vm4 = vweird.f32 %v1253_v33  ;;  %v341_v18 = vadd.f32 1e-12, %v331_v12 }
  0xa8   : > { %v1605_v36 = vpop.eup %1256  ;;  %v374_v39 = vmul.f32 %v1255_v34, %v1600_v25  ;;  %vm361_vm6 = vmor %vm359_vm5, %vm360_vm4  ;;  %vm380_vm8 = vweird.f32 %v1255_v34  ;;  %1262 = vrsqrt.f32 %v342_v13 }
  0xa9   : > { %v355_v38 = vmul.f32 %v1253_v33, %v354_v35  ;;  %v364_v43 = vmul.f32 %v1605_v36, %v1598_v23  ;;  %v352_v47 = vsel %vm351_vm3, %v1251_v22, %v348_v40  ;;  %v1259_v2 = vpop.eup %1258  ;;  %vm370_vm10 = vweird.f32 %v1605_v36  ;;  %vm381_vm11 = vmor %vm379_vm7, %vm380_vm8 }
  0xaa   : > { %v375_v46 = vmul.f32 %v1255_v34, %v374_v39  ;;  %v606_v52 = vmul.f32 %v528_v28, %v352_v47  ;;  %v607_v53 = vmul.f32 %v557_v30, %v352_v47  ;;  %v1261_v59 = vpop.eup %1260  ;;  %v394_v6 = vmul.f32 %v1259_v2, %v1610_v45  ;;  %vm371_vm12 = vmor %vm369_vm9, %vm370_vm10 }
  0xab   : > { %v356_v44 = vmul.f32 0.5, %v355_v38  ;;  %v365_v50 = vmul.f32 %v1605_v36, %v364_v43  ;;  %v384_v10 = vmul.f32 %v1261_v59, %v1612_v49  ;;  %1264 = vrsqrt.f32 %v341_v18 }
  0xac   : > { %v530_v37 = vpop.f32.mrf.mxu0  ;;  %v376_v55 = vmul.f32 0.5, %v375_v46  ;;  %v1619_v63 = vmax.f32 %v606_v52, %v607_v53  ;;  %v395_v14 = vmul.f32 %v1259_v2, %v394_v6  ;;  %vm400_vm14 = vweird.f32 %v1259_v2 }
  0xad   : > { %v559_v41 = vpop.f32.mrf.mxu1  ;;  %v357_v48 = vsub.f32 1.5, %v356_v44  ;;  %v366_v62 = vmul.f32 0.5, %v365_v50  ;;  %v385_v19 = vmul.f32 %v1261_v59, %v384_v10  ;;  %vm390_vm0 = vweird.f32 %v1261_v59  ;;  %vm401_vm1 = vmor %vm399_vm13, %vm400_vm14  ;;  %v1248_v10 = vld [vmem:[%s1770_s4] ss:$0 sm:$0xff] }
  0xae   : > { %v377_v1 = vsub.f32 1.5, %v376_v55  ;;  %v396_v24 = vmul.f32 0.5, %v395_v14  ;;  %v1263_v30 = vpop.eup %1262  ;;  %vm391_vm2 = vmor %vm389_vm15, %vm390_vm0  ;;  %vm419_vm3 = vweird.f32 %v342_v13  ;;  %vm409_vm5 = vweird.f32 %v341_v18  ;;  %v1249_v14 = vld [vmem:[%s1771_s5] ss:$0 sm:$0xff] }
  0xaf   : > { %v358_v51 = vmul.f32 %v1253_v33, %v357_v48  ;;  %v367_v4 = vsub.f32 1.5, %v366_v62  ;;  %v386_v27 = vmul.f32 0.5, %v385_v19  ;;  %vm420_vm4 = vweird.f32 %v1263_v30 }
  0xb0   : > { %v378_v7 = vmul.f32 %v1255_v34, %v377_v1  ;;  %v397_v29 = vsub.f32 1.5, %v396_v24  ;;  %vm421_vm7 = vmor %vm419_vm3, %vm420_vm4 }
  0xb1   : > { %v362_v56 = vsel %vm361_vm6, %v1253_v33, %v358_v51  ;;  %v368_v11 = vmul.f32 %v1605_v36, %v367_v4  ;;  %v387_v32 = vsub.f32 1.5, %v386_v27  ;;  %v1265_v33 = vpop.eup %1264 }
  0xb2   : > { %v608_v58 = vmul.f32 %v530_v37, %v362_v56  ;;  %v609_v61 = vmul.f32 %v559_v41, %v362_v56  ;;  %v382_v15 = vsel %vm381_vm11, %v1255_v34, %v378_v7  ;;  %v414_v34 = vmul.f32 %v1263_v30, %v342_v13 }
  0xb3   : > { %v372_v20 = vsel %vm371_vm12, %v1605_v36, %v368_v11  ;;  %v398_v35 = vmul.f32 %v1259_v2, %v397_v29  ;;  %v404_v37 = vmul.f32 %v1265_v33, %v341_v18  ;;  %v388_v38 = vmul.f32 %v1261_v59, %v387_v32 }
  0xb4   : > { %v533_v54 = vpop.f32.mrf.mxu0  ;;  %v1621_v0 = vmax.f32 %v608_v58, %v609_v61  ;;  %v415_v39 = vmul.f32 %v1263_v30, %v414_v34  ;;  %vm410_vm6 = vweird.f32 %v1265_v33 }
  0xb5   : > { %v562_v57 = vpop.f32.mrf.mxu1  ;;  %v610_v21 = vmul.f32 %v533_v54, %v372_v20  ;;  %v402_v40 = vsel %vm401_vm1, %v1259_v2, %v398_v35  ;;  %v405_v43 = vmul.f32 %v1265_v33, %v404_v37  ;;  %v392_v44 = vsel %vm391_vm2, %v1261_v59, %v388_v38  ;;  %vm411_vm8 = vmor %vm409_vm5, %vm410_vm6 }
  0xb6   : > { %v630_v3 = vpack.c.bf16 %v1621_v0, %v1619_v63  ;;  %v611_v22 = vmul.f32 %v562_v57, %v372_v20  ;;  %v416_v47 = vmul.f32 0.5, %v415_v39 }
  0xb7   : > { %v406_v49 = vmul.f32 0.5, %v405_v43 }
  0xb8   : > { %706 = vmatmul.bf16.vlgmr.msra.gmra.mxu3 %v630_v3  ;;  %v1636_v28 = vmax.f32 %v610_v21, %v611_v22  ;;  %v417_v53 = vsub.f32 1.5, %v416_v47 }
  0xb9   : > { %v407_v55 = vsub.f32 1.5, %v406_v49 }
  0xba   : > { %v418_v56 = vmul.f32 %v1263_v30, %v417_v53 }
  0xbb   : > { %v408_v57 = vmul.f32 %v1265_v33, %v407_v55 }
  0xbc   : > { %v535_v5 = vpop.f32.mrf.mxu0  ;;  %v422_v62 = vsel %vm421_vm7, %v1263_v30, %v418_v56 }
  0xbd   : > { %v564_v8 = vpop.f32.mrf.mxu1  ;;  %v612_v16 = vmul.f32 %v535_v5, %v382_v15  ;;  %v412_v3 = vsel %vm411_vm8, %v1265_v33, %v408_v57 }
  0xbe   : > { %v613_v17 = vmul.f32 %v564_v8, %v382_v15  ;;  %v586_v8 = vpop.f32.mrf.mxu2 }
  0xc0   : > { %v1634_v26 = vmax.f32 %v612_v16, %v613_v17 }
  0xc2   : > { %v631_v31 = vpack.c.bf16 %v1634_v26, %v1636_v28 }
  0xc4   : > { %v538_v23 = vpop.f32.mrf.mxu0 }
  0xc5   : > { %v567_v25 = vpop.f32.mrf.mxu1  ;;  %v614_v45 = vmul.f32 %v538_v23, %v392_v44 }
  0xc6   : > { %v615_v46 = vmul.f32 %v567_v25, %v392_v44  ;;  %v588_v9 = vpop.f32.mrf.mxu2 }
  0xc8   : > { %711 = vmatmul.bf16.gmra.mxu3 %v631_v31  ;;  %v1644_v52 = vmax.f32 %v614_v45, %v615_v46 }
  0xcc   : > { %v540_v60 = vpop.f32.mrf.mxu0 }
  0xcd   : > { %v569_v36 = vpop.f32.mrf.mxu1  ;;  %v616_v41 = vmul.f32 %v540_v60, %v402_v40 }
  0xce   : > { %v617_v42 = vmul.f32 %v569_v36, %v402_v40  ;;  %v591_v16 = vpop.f32.mrf.mxu2 }
  0xd0   : > { %v1642_v51 = vmax.f32 %v616_v41, %v617_v42 }
  0xd2   : > { %v632_v54 = vpack.c.bf16 %v1642_v51, %v1644_v52 }
  0xd4   : > { %v543_v48 = vpop.f32.mrf.mxu0 }
  0xd5   : > { %v572_v50 = vpop.f32.mrf.mxu1  ;;  %v618_v4 = vmul.f32 %v543_v48, %v412_v3 }
  0xd6   : > { %v619_v59 = vmul.f32 %v572_v50, %v412_v3  ;;  %v593_v23 = vpop.f32.mrf.mxu2 }
  0xd8   : > { %716 = vmatmul.bf16.gmra.mxu3 %v632_v54  ;;  %v1650_v6 = vmax.f32 %v618_v4, %v619_v59 }
  0xdc   : > { %v545_v58 = vpop.f32.mrf.mxu0 }
  0xdd   : > { %v574_v61 = vpop.f32.mrf.mxu1  ;;  %v620_v1 = vmul.f32 %v545_v58, %v422_v62 }
  0xde   : > { %v621_v2 = vmul.f32 %v574_v61, %v422_v62  ;;  %v596_v33 = vpop.f32.mrf.mxu2 }
  0xe0   : > { %v1648_v5 = vmax.f32 %v620_v1, %v621_v2  ;;  %v1660_v1 = vstv %s783_s14 }
  0xe2   : > { %v633_v7 = vpack.c.bf16 %v1648_v5, %v1650_v6 }
  0xe6   : > { %v598_v39 = vpop.f32.mrf.mxu2 }
  0xe8   : > { %721 = vmatmul.bf16.gmra.mxu3 %v633_v7 }
  0xee   : > { %v601_v46 = vpop.f32.mrf.mxu2 }
  0xf6   : > { %v603_v55 = vpop.f32.mrf.mxu2 }
 0x13b   : > { %v707_v11 = vpop.f32.mrf.mxu3 }
 0x13c   : > { %v727_v12 = vadd.f32 %v707_v11, %v586_v8 }
 0x13e   : > { %v739_v13 = vadd.f32 %v1248_v10, %v727_v12 }
 0x140   : > { %v747_v15 = vmax.f32 %v739_v13, 0.0 }
 0x142   : > { %v759_v17 = vmul.f32 %v1249_v14, %v747_v15 }
 0x143   : > { %v709_v18 = vpop.f32.mrf.mxu3 }
 0x144   : > { %v728_v19 = vadd.f32 %v709_v18, %v588_v9  ;;  %767 = vadd.xlane.f32.xlu2 %v759_v17 }
 0x146   : > { %v740_v20 = vadd.f32 %v1248_v10, %v728_v19 }
 0x148   : > { %v748_v21 = vmax.f32 %v740_v20, 0.0 }
 0x14a   : > { %v760_v22 = vmul.f32 %v1249_v14, %v748_v21 }
 0x14b   : > { %v712_v24 = vpop.f32.mrf.mxu3 }
 0x14c   : > { %v729_v25 = vadd.f32 %v712_v24, %v591_v16  ;;  %769 = vadd.xlane.f32.xlu0 %v760_v22 }
 0x14e   : > { %v741_v27 = vadd.f32 %v1248_v10, %v729_v25  ;;  %v945_v25 = vlaneseq }
 0x150   : > { %v749_v29 = vmax.f32 %v741_v27, 0.0 }
 0x152   : > { %v761_v30 = vmul.f32 %v1249_v14, %v749_v29 }
 0x153   : > { %v714_v31 = vpop.f32.mrf.mxu3 }
 0x154   : > { %v730_v32 = vadd.f32 %v714_v31, %v593_v23  ;;  %771 = vadd.xlane.f32.xlu1 %v761_v30 }
 0x156   : > { %v742_v60 = vadd.f32 %v1248_v10, %v730_v32 }
 0x158   : > { %v750_v34 = vmax.f32 %v742_v60, 0.0  ;;  %v1669_v60 = vand.u32 127, %v945_v25 }
 0x15a   : > { %v762_v35 = vmul.f32 %v1249_v14, %v750_v34  ;;  %vm947_vm15 = vcmp.eq.s32.totalorder %v1669_v60, 4 }
 0x15b   : > { %v717_v36 = vpop.f32.mrf.mxu3 }
 0x15c   : > { %v731_v37 = vadd.f32 %v717_v36, %v596_v33  ;;  %773 = vadd.xlane.f32.xlu2 %v762_v35 }
 0x15e   : > { %v743_v38 = vadd.f32 %v1248_v10, %v731_v37 }
 0x160   : > { %v751_v40 = vmax.f32 %v743_v38, 0.0 }
 0x162   : > { %v763_v41 = vmul.f32 %v1249_v14, %v751_v40 }
 0x163   : > { %v719_v42 = vpop.f32.mrf.mxu3 }
 0x164   : > { %v732_v43 = vadd.f32 %v719_v42, %v598_v39  ;;  %775 = vadd.xlane.f32.xlu0 %v763_v41 }
 0x166   : > { %v744_v44 = vadd.f32 %v1248_v10, %v732_v43 }
 0x168   : > { %v752_v45 = vmax.f32 %v744_v44, 0.0 }
 0x16a   : > { %v764_v47 = vmul.f32 %v1249_v14, %v752_v45 }
 0x16b   : > { %v722_v48 = vpop.f32.mrf.mxu3 }
 0x16c   : > { %v733_v50 = vadd.f32 %v722_v48, %v601_v46  ;;  %777 = vadd.xlane.f32.xlu1 %v764_v47 }
 0x16e   : > { %v745_v49 = vadd.f32 %v1248_v10, %v733_v50 }
 0x170   : > { %v753_v53 = vmax.f32 %v745_v49, 0.0 }
 0x172   : > { %v765_v54 = vmul.f32 %v1249_v14, %v753_v53 }
 0x173   : > { %v724_v56 = vpop.f32.mrf.mxu3 }
 0x174   : > { %v734_v57 = vadd.f32 %v724_v56, %v603_v55  ;;  %779 = vadd.xlane.f32.xlu2 %v765_v54 }
 0x176   : > { %v746_v58 = vadd.f32 %v1248_v10, %v734_v57 }
 0x178   : > { %v754_v61 = vmax.f32 %v746_v58, 0.0 }
 0x17a   : > { %v766_v62 = vmul.f32 %v1249_v14, %v754_v61 }
 0x17c   : > { %781 = vadd.xlane.f32.xlu0 %v766_v62 }
 0x1b7   : > { %v768_v2 = vpop.xlane.xlu2 %767 }
 0x1b8   : > { %v785_v3 = vadd.f32 %v1660_v1, %v768_v2 }
 0x1ba   : > { %v1149_v4 = vmul.f32 -1.442695, %v785_v3 }
 0x1bc   : > { %1266 = vpow2.f32 %v1149_v4 }
 0x1bf   : > { %v770_v59 = vpop.xlane.xlu0 %769 }
 0x1c0   : > { %v786_v7 = vadd.f32 %v1660_v1, %v770_v59 }
 0x1c2   : > { %v1267_v8 = vpop.eup %1266  ;;  %v1150_v9 = vmul.f32 -1.442695, %v786_v7 }
 0x1c3   : > { %v817_v11 = vadd.f32 1.0, %v1267_v8 }
 0x1c4   : > { %1268 = vpow2.f32 %v1150_v9 }
 0x1c5   : > { %1270 = vrcp.f32 %v817_v11  ;;  %v836_v31 = vand.u32 2147483648, %v817_v11  ;;  %vm830_vm10 = vweird.f32 %v817_v11  ;;  %v834_v32 = vand.u32 2147483647, %v817_v11 }
 0x1c7   : > { %v772_v10 = vpop.xlane.xlu1 %771  ;;  %v837_v41 = vor.u32 1.1754944e-38, %v836_v31  ;;  %vm835_vm13 = vcmp.eq.f32.partialorder %v834_v32, 8.507059e+37 }
 0x1c8   : > { %v787_v12 = vadd.f32 %v1660_v1, %v772_v10 }
 0x1ca   : > { %v1269_v13 = vpop.eup %1268  ;;  %v1151_v14 = vmul.f32 -1.442695, %v787_v12 }
 0x1cb   : > { %v1271_v15 = vpop.eup %1270  ;;  %v818_v16 = vadd.f32 1.0, %v1269_v13 }
 0x1cc   : > { %v826_v17 = vmul.f32 %v1271_v15, %v817_v11  ;;  %1272 = vpow2.f32 %v1151_v14  ;;  %vm831_vm9 = vweird.f32 %v1271_v15 }
 0x1cd   : > { %1274 = vrcp.f32 %v818_v16  ;;  %vm1671_vm11 = vmor %vm830_vm10, %vm831_vm9  ;;  %v849_v35 = vand.u32 2147483647, %v818_v16  ;;  %v851_v36 = vand.u32 2147483648, %v818_v16  ;;  %vm845_vm14 = vweird.f32 %v818_v16 }
 0x1ce   : > { %v827_v18 = vsub.f32 1.0, %v826_v17 }
 0x1cf   : > { %v774_v19 = vpop.xlane.xlu2 %773  ;;  %v852_v47 = vor.u32 1.1754944e-38, %v851_v36  ;;  %vm850_vm1 = vcmp.eq.f32.partialorder %v849_v35, 8.507059e+37 }
 0x1d0   : > { %v828_v20 = vmul.f32 %v1271_v15, %v827_v18  ;;  %v788_v21 = vadd.f32 %v1660_v1, %v774_v19 }
 0x1d2   : > { %v1273_v22 = vpop.eup %1272  ;;  %v1152_v23 = vmul.f32 -1.442695, %v788_v21  ;;  %v829_v29 = vadd.f32 %v1271_v15, %v828_v20 }
 0x1d3   : > { %v1275_v24 = vpop.eup %1274  ;;  %v1666_v27 = vadd.f32 1.0, %v1273_v22 }
 0x1d4   : > { %v841_v30 = vmul.f32 %v1275_v24, %v818_v16  ;;  %1276 = vpow2.f32 %v1152_v23  ;;  %v833_v38 = vsel %vm1671_vm11, %v1271_v15, %v829_v29  ;;  %vm846_vm12 = vweird.f32 %v1275_v24 }
 0x1d5   : > { %1278 = vrcp.f32 %v1666_v27  ;;  %v838_v46 = vsel %vm835_vm13, %v837_v41, %v833_v38  ;;  %vm847_vm0 = vmor %vm845_vm14, %vm846_vm12  ;;  %vm860_vm3 = vweird.f32 %v1666_v27  ;;  %v864_v8 = vand.u32 2147483647, %v1666_v27 }
 0x1d6   : > { %v842_v33 = vsub.f32 1.0, %v841_v30  ;;  %v948_v54 = vsel %vm947_vm15, %v838_v46, %v1619_v63 }
 0x1d7   : > { %v776_v37 = vpop.xlane.xlu0 %775  ;;  %vm865_vm6 = vcmp.eq.f32.partialorder %v864_v8, 8.507059e+37 }
 0x1d8   : > { %v843_v39 = vmul.f32 %v1275_v24, %v842_v33  ;;  %v789_v40 = vadd.f32 %v1660_v1, %v776_v37 }
 0x1da   : > { %v1277_v42 = vpop.eup %1276  ;;  %v844_v43 = vadd.f32 %v1275_v24, %v843_v39  ;;  %v1153_v44 = vmul.f32 -1.442695, %v789_v40 }
 0x1db   : > { %v1279_v45 = vpop.eup %1278  ;;  %v820_v48 = vadd.f32 1.0, %v1277_v42 }
 0x1dc   : > { %v848_v50 = vsel %vm847_vm0, %v1275_v24, %v844_v43  ;;  %v856_v49 = vmul.f32 %v1279_v45, %v1666_v27  ;;  %1280 = vpow2.f32 %v1153_v44  ;;  %vm861_vm2 = vweird.f32 %v1279_v45 }
 0x1dd   : > { %v853_v53 = vsel %vm850_vm1, %v852_v47, %v848_v50  ;;  %1282 = vrcp.f32 %v820_v48  ;;  %vm1699_vm4 = vmor %vm860_vm3, %vm861_vm2  ;;  %v879_v10 = vand.u32 2147483647, %v820_v48  ;;  %v881_v12 = vand.u32 2147483648, %v820_v48 }
 0x1de   : > { %v949_v55 = vsel %vm947_vm15, %v853_v53, %v1621_v0  ;;  %v857_v56 = vsub.f32 1.0, %v856_v49  ;;  %v866_v0 = vand.u32 2147483648, %v1666_v27  ;;  %vm875_vm7 = vweird.f32 %v820_v48 }
 0x1df   : > { %v778_v57 = vpop.xlane.xlu1 %777  ;;  %v1186_v58 = vpack.c.bf16 %v949_v55, %v948_v54  ;;  %v882_v23 = vor.u32 1.1754944e-38, %v881_v12  ;;  %vm880_vm9 = vcmp.eq.f32.partialorder %v879_v10, 8.507059e+37 }
 0x1e0   : > { %v858_v61 = vmul.f32 %v1279_v45, %v857_v56  ;;  %v790_v62 = vadd.f32 %v1660_v1, %v778_v57  ;;  %v867_v17 = vor.u32 1.1754944e-38, %v866_v0 }
 0x1e1   : > { %1187 = vst [vmem:[%s1690_s17] sm:$0xff] %v1186_v58  }
 0x1e2   : > { %v1281_v2 = vpop.eup %1280  ;;  %v1154_v3 = vmul.f32 -1.442695, %v790_v62  ;;  %v859_v63 = vadd.f32 %v1279_v45, %v858_v61 }
 0x1e3   : > { %v1283_v4 = vpop.eup %1282  ;;  %v1693_v59 = vadd.f32 1.0, %v1281_v2 }
 0x1e4   : > { %v871_v7 = vmul.f32 %v1283_v4, %v820_v48  ;;  %1284 = vpow2.f32 %v1154_v3  ;;  %v863_v14 = vsel %vm1699_vm4, %v1279_v45, %v859_v63  ;;  %vm876_vm5 = vweird.f32 %v1283_v4 }
 0x1e5   : > { %1286 = vrcp.f32 %v1693_v59  ;;  %v868_v22 = vsel %vm865_vm6, %v867_v17, %v863_v14  ;;  %vm877_vm8 = vmor %vm875_vm7, %vm876_vm5  ;;  %vm890_vm11 = vweird.f32 %v1693_v59 }
 0x1e6   : > { %v872_v9 = vsub.f32 1.0, %v871_v7  ;;  %v950_v30 = vsel %vm947_vm15, %v868_v22, %v1636_v28  ;;  %v896_v28 = vand.u32 2147483648, %v1693_v59 }
 0x1e7   : > { %v780_v13 = vpop.xlane.xlu2 %779 }
 0x1e8   : > { %v873_v15 = vmul.f32 %v1283_v4, %v872_v9  ;;  %v791_v16 = vadd.f32 %v1660_v1, %v780_v13  ;;  %v897_v47 = vor.u32 1.1754944e-38, %v896_v28 }
 0x1ea   : > { %v1285_v18 = vpop.eup %1284  ;;  %v874_v19 = vadd.f32 %v1283_v4, %v873_v15  ;;  %v1155_v20 = vmul.f32 -1.442695, %v791_v16 }
 0x1eb   : > { %v1287_v21 = vpop.eup %1286  ;;  %v822_v24 = vadd.f32 1.0, %v1285_v18 }
 0x1ec   : > { %v878_v25 = vsel %vm877_vm8, %v1283_v4, %v874_v19  ;;  %v886_v27 = vmul.f32 %v1287_v21, %v1693_v59  ;;  %1288 = vpow2.f32 %v1155_v20  ;;  %vm891_vm10 = vweird.f32 %v1287_v21 }
 0x1ed   : > { %v883_v29 = vsel %vm880_vm9, %v882_v23, %v878_v25  ;;  %1290 = vrcp.f32 %v822_v24  ;;  %vm892_vm12 = vmor %vm890_vm11, %vm891_vm10  ;;  %v911_v44 = vand.u32 2147483648, %v822_v24  ;;  %v909_v46 = vand.u32 2147483647, %v822_v24 }
 0x1ee   : > { %v951_v31 = vsel %vm947_vm15, %v883_v29, %v1634_v26  ;;  %v887_v32 = vsub.f32 1.0, %v886_v27  ;;  %v894_v26 = vand.u32 2147483647, %v1693_v59  ;;  %vm905_vm0 = vweird.f32 %v822_v24 }
 0x1ef   : > { %v782_v33 = vpop.xlane.xlu0 %781  ;;  %v1191_v34 = vpack.c.bf16 %v951_v31, %v950_v30  ;;  %v912_v54 = vor.u32 1.1754944e-38, %v911_v44  ;;  %vm910_vm2 = vcmp.eq.f32.partialorder %v909_v46, 8.507059e+37 }
 0x1f0   : > { %v888_v35 = vmul.f32 %v1287_v21, %v887_v32  ;;  %v792_v36 = vadd.f32 %v1660_v1, %v782_v33  ;;  %vm895_vm14 = vcmp.eq.f32.partialorder %v894_v26, 8.507059e+37 }
 0x1f1   : > { %1203 = vst [vmem:[%s1690_s17 + $0x8] sm:$0xff] %v1191_v34  }
 0x1f2   : > { %v1289_v37 = vpop.eup %1288  ;;  %v1156_v38 = vmul.f32 -1.442695, %v792_v36  ;;  %v889_v41 = vadd.f32 %v1287_v21, %v888_v35 }
 0x1f3   : > { %v1291_v39 = vpop.eup %1290  ;;  %v823_v40 = vadd.f32 1.0, %v1289_v37 }
 0x1f4   : > { %v901_v42 = vmul.f32 %v1291_v39, %v822_v24  ;;  %1292 = vpow2.f32 %v1156_v38  ;;  %v893_v1 = vsel %vm892_vm12, %v1287_v21, %v889_v41  ;;  %vm906_vm13 = vweird.f32 %v1291_v39 }
 0x1f5   : > { %1294 = vrcp.f32 %v823_v40  ;;  %v898_v53 = vsel %vm895_vm14, %v897_v47, %v893_v1  ;;  %vm907_vm1 = vmor %vm905_vm0, %vm906_vm13  ;;  %v926_v0 = vand.u32 2147483648, %v823_v40  ;;  %vm920_vm4 = vweird.f32 %v823_v40 }
 0x1f6   : > { %v902_v43 = vsub.f32 1.0, %v901_v42  ;;  %v952_v61 = vsel %vm947_vm15, %v898_v53, %v1644_v52  ;;  %v924_v8 = vand.u32 2147483647, %v823_v40 }
 0x1f7   : > { %v927_v12 = vor.u32 1.1754944e-38, %v926_v0 }
 0x1f8   : > { %v903_v45 = vmul.f32 %v1291_v39, %v902_v43  ;;  %vm925_vm7 = vcmp.eq.f32.partialorder %v924_v8, 8.507059e+37 }
 0x1fa   : > { %v1293_v48 = vpop.eup %1292  ;;  %v904_v50 = vadd.f32 %v1291_v39, %v903_v45 }
 0x1fb   : > { %v1295_v49 = vpop.eup %1294  ;;  %v824_v55 = vadd.f32 1.0, %v1293_v48 }
 0x1fc   : > { %v908_v56 = vsel %vm907_vm1, %v1291_v39, %v904_v50  ;;  %v916_v57 = vmul.f32 %v1295_v49, %v823_v40  ;;  %vm921_vm3 = vweird.f32 %v1295_v49 }
 0x1fd   : > { %v913_v58 = vsel %vm910_vm2, %v912_v54, %v908_v56  ;;  %1296 = vrcp.f32 %v824_v55  ;;  %vm922_vm5 = vmor %vm920_vm4, %vm921_vm3  ;;  %v941_v52 = vand.u32 2147483648, %v824_v55  ;;  %vm935_vm8 = vweird.f32 %v824_v55 }
 0x1fe   : > { %v953_v62 = vsel %vm947_vm15, %v913_v58, %v1642_v51  ;;  %v917_v2 = vsub.f32 1.0, %v916_v57  ;;  %v939_v51 = vand.u32 2147483647, %v824_v55 }
 0x1ff   : > { %v1196_v3 = vpack.c.bf16 %v953_v62, %v952_v61  ;;  %v942_v15 = vor.u32 1.1754944e-38, %v941_v52 }
 0x200   : > { %v918_v4 = vmul.f32 %v1295_v49, %v917_v2  ;;  %vm940_vm10 = vcmp.eq.f32.partialorder %v939_v51, 8.507059e+37 }
 0x201   : > { %1204 = vst [vmem:[%s1690_s17 + $0x10] sm:$0xff] %v1196_v3  }
 0x202   : > { %v919_v63 = vadd.f32 %v1295_v49, %v918_v4 }
 0x203   : > { %v1297_v59 = vpop.eup %1296 }
 0x204   : > { %v931_v7 = vmul.f32 %v1297_v59, %v824_v55  ;;  %v923_v11 = vsel %vm922_vm5, %v1295_v49, %v919_v63  ;;  %vm936_vm6 = vweird.f32 %v1297_v59 }
 0x205   : > { %v928_v14 = vsel %vm925_vm7, %v927_v12, %v923_v11  ;;  %vm937_vm9 = vmor %vm935_vm8, %vm936_vm6 }
 0x206   : > { %v932_v9 = vsub.f32 1.0, %v931_v7  ;;  %v954_v18 = vsel %vm947_vm15, %v928_v14, %v1650_v6 }
 0x208   : > { %v933_v10 = vmul.f32 %v1297_v59, %v932_v9 }
 0x20a   : > { %v934_v13 = vadd.f32 %v1297_v59, %v933_v10 }
 0x20c   : > { %v938_v16 = vsel %vm937_vm9, %v1297_v59, %v934_v13 }
 0x20d   : > { %v943_v17 = vsel %vm940_vm10, %v942_v15, %v938_v16 }
 0x20e   : > { %v955_v19 = vsel %vm947_vm15, %v943_v17, %v1648_v5 }
 0x20f   : > { %v1201_v20 = vpack.c.bf16 %v955_v19, %v954_v18 }
 0x211   : > { %1205 = vst [vmem:[%s1690_s17 + $0x18] sm:$0xff] %v1201_v20  }
 0x212   : > { %1325 = shalt.err (!%p1322_p3)
}
 0x213   : > { %s1362_s15 = smov 64   ;;  %s1363_s17 = smov 4  }
 0x214   : > { %1206 = dma.vmem_to_hbm [thread:$0]  (%p1445_p5), %s986_s6, 512, %s988_s23, %s973_s19, %s1362_s15, %s1362_s15, %s1363_s17  }
 0x215 PF: > { %p1212_p4 = scmp.ge.s32.totalorder %s1360_s29, 2  ;;  %s1002_s18 = sand.u32 1, %s1348_s26  }
 0x216   : > { %s1003_s20 = scalar_lea.sflag [#allocation4], %s1002_s18 }
 0x217   : > { %p1209_p7 = pnand %p1212_p4, %p1449_p6 }
 0x219   : > { %p1210_p8 = pneg %p1209_p7 }
 0x21b   : > { %1343 = dma.done.wait (%p1210_p8), %s1003_s20, 512  }
 0x21c   : > { %1345 = vsyncadd (%p1210_p8), %s1003_s20, 4294966784  ;;  %p18_p9 = scmp.ge.s32.totalorder %s1432_s8, 4   ;;  %s1780_s26 = smov %s1352_s27 }
 0x21d   : > { %s1781_s27 = smov %s1356_s28  ;;  %s1782_s28 = smov %s1443_s11 }
 0x21e   : > { %s1783_s29 = smov %s1432_s8  ;;  %20 = sbr.rel (!%p18_p9) target bundleno = 5 (0x5), region = 83 }
 0x223   :  { %1009 = vsyncpa [#allocation4], 1 }
 0x224   :  { %1011 = vsyncpa [#allocation4 + $0x1], 1 }

</bundles_post_ra>
